<compile_context>
chip_gen: v7x
topology: tpu7x:2x2x1
jax: 0.10.0
libtpu: 0.0.40
codegen_flags: <defaults>
</compile_context>

<pallas_src>
from functools import partial

import jax
import jax.numpy as jnp
from jax.experimental import pallas as pl
from jax.experimental.pallas import tpu as pltpu

HIDDEN_SIZE = 8
INPUT_SIZE = 2
NUM_CLASSES = 1
NUM_LAYERS = 2          # implemented explicitly as two stacked (wavefront-skewed) cells
BATCH_PAD = 8           # pad batch to one full sublane tile
OUT_LANES = 128         # lane-dense padded output width


def lstm_fc_kernel(xp_ref, wxin_ref, badd_ref, wfused_ref, wep_ref, b1ep_ref,
                   wfc_ref, bfc_ref, out_ref, *, batch_padded, seq_len):
    """Wavefront-fused 2-layer LSTM recurrence + final Linear.

    xp_ref:     (T*Bp, I)  time-major, batch padded to Bp=8.
    wxin_ref:   (I, 8H)    layer-0 input weights in interleaved gate layout
                           [i0 i1 f0 f1 g0 g1 o0 o1]; layer-1 columns are zero.
                           i/f/o columns pre-scaled by 0.5 (sigmoid-via-tanh).
    badd_ref:   (1, 8H)    per-step additive biases (b0 | b1, same layout/scale).
    wfused_ref: (2H, 8H)   fused recurrent weight; LHS layout [h0 | h1].
    wep_ref:    (2H, 4H)   layer-1 weights for the epilogue step, [i f g o].
    b1ep_ref:   (1, 4H)    layer-1 bias for the epilogue step.
    wfc_ref:    (H, 128)   fc weight padded to 128 lanes (cols >= C are zero).
    bfc_ref:    (1, 128)   fc bias padded likewise.
    out_ref:    (Bp, 128)  lane-dense output block; wrapper slices [:B, :C].
    """
    Bp, T = batch_padded, seq_len
    H = HIDDEN_SIZE
    H2, H3, H4, H6, H8 = 2 * H, 3 * H, 4 * H, 6 * H, 8 * H

    xp = xp_ref[...]            # (T*Bp, I)
    W_xin = wxin_ref[...]       # (I, 8H)
    b_add = badd_ref[...]       # (1, 8H)
    W_fused = wfused_ref[...]   # (2H, 8H)
    W_ep = wep_ref[...]         # (2H, 4H)
    b1_ep = b1ep_ref[...]       # (1, 4H)
    W_fc = wfc_ref[...]         # (H, 128)
    b_fc = bfc_ref[...]         # (1, 128)

    # Hoisted: one MXU pass builds the additive gate term of every time step
    # (layer-0 x-side gates + both layers' biases), already sigmoid-scaled.
    xgb_all = jnp.dot(xp, W_xin, preferred_element_type=jnp.float32) + b_add  # (T*Bp, 8H)

    # Lane masks, hoisted once (JAX does not CSE broadcast_in_dim).
    lane8 = jax.lax.broadcasted_iota(jnp.int32, (Bp, H8), 1)
    is_g8 = jnp.logical_and(lane8 >= H4, lane8 < H6)       # g0|g1 block
    lane4 = jax.lax.broadcasted_iota(jnp.int32, (Bp, H4), 1)
    is_g4 = jnp.logical_and(lane4 >= H2, lane4 < H3)
    keep_l0 = jax.lax.broadcasted_iota(jnp.int32, (Bp, H2), 1) < H

    def activate(g, is_g):
        # Single EUP push: sigmoid gates were pre-scaled by 0.5 so that
        # sigmoid(z) == 0.5 * tanh(z/2) + 0.5; the recovery is pure VPU work.
        th = jnp.tanh(g)
        return jnp.where(is_g, th, 0.5 * th + 0.5)

    def cell_update(act, c, w):
        i = act[:, 0 * w:1 * w]
        f = act[:, 1 * w:2 * w]
        g = act[:, 2 * w:3 * w]
        o = act[:, 3 * w:4 * w]
        c_new = f * c + i * g
        h_new = o * jnp.tanh(c_new)      # one tanh(c) shared by both layers
        return h_new, c_new

    # Combined state [h0 | h1] / [c0 | c1]; after loop step t it holds
    # [h0(t) | h1(t-1)] -- exactly the LHS needed by the next fused matmul,
    # so no per-step concatenate / relayout is required.
    h_cat = jnp.zeros((Bp, H2), jnp.float32)
    c_cat = jnp.zeros((Bp, H2), jnp.float32)

    # Wavefront-skewed recurrence: step t computes layer0(t) and layer1(t-1)
    # with a single (Bp,2H)@(2H,8H) matmul.  T is tiny & static -> unrolled.
    for t in range(T):
        g_all = xgb_all[t * Bp:(t + 1) * Bp, :]          # 8-aligned row slice
        if t > 0:
            g_all = g_all + jnp.dot(h_cat, W_fused,
                                    preferred_element_type=jnp.float32)
        h_new, c_new = cell_update(activate(g_all, is_g8), c_cat, H2)
        if t == 0:
            # Layer 1 has not started yet: keep its half of the state at zero.
            h_new = jnp.where(keep_l0, h_new, 0.0)
            c_new = jnp.where(keep_l0, c_new, 0.0)
        h_cat, c_cat = h_new, c_new

    # Epilogue: layer-1 final step (time T-1), then the fc head.
    g1 = jnp.dot(h_cat, W_ep, preferred_element_type=jnp.float32) + b1_ep  # (Bp, 4H)
    h1, _ = cell_update(activate(g1, is_g4), c_cat[:, H:H2], H)
    out = jnp.dot(h1, W_fc, preferred_element_type=jnp.float32) + b_fc     # (Bp, 128)
    out_ref[...] = out.astype(out_ref.dtype)


def _interleave_gates(a, b):
    """Interleave two (..., 4H) gate blocks into (..., 8H) = [i0 i1 f0 f1 g0 g1 o0 o1]."""
    H = HIDDEN_SIZE
    lead = a.shape[:-1]
    a4 = a.reshape(lead + (4, H))
    b4 = b.reshape(lead + (4, H))
    return jnp.stack([a4, b4], axis=-2).reshape(lead + (8 * H,))


def lstm_model_forward(x, params):
    """Pallas wrapper.  All layout plumbing (gate interleave, sigmoid 0.5 fold,
    batch/lane padding, time-major flatten) is done here with plain XLA ops so
    the kernel only sees lane-friendly 2-D operands."""
    B, T, I = x.shape
    H = HIDDEN_SIZE
    Bp = BATCH_PAD

    # 0.5 fold on i/f/o columns so the kernel uses one tanh for all gates.
    s4 = jnp.concatenate([jnp.full((H,), 0.5), jnp.full((H,), 0.5),
                          jnp.ones((H,)), jnp.full((H,), 0.5)]).astype(jnp.float32)

    w_ih0 = params["w_ih0"] * s4           # (I, 4H)
    w_hh0 = params["w_hh0"] * s4           # (H, 4H)
    b0 = params["b0"] * s4                 # (4H,)
    w_ih1 = params["w_ih1"] * s4           # (H, 4H)
    w_hh1 = params["w_hh1"] * s4           # (H, 4H)
    b1 = params["b1"] * s4                 # (4H,)

    # Layer-0 input-side weights in the interleaved 8H layout (layer-1 cols = 0).
    w_xin = _interleave_gates(w_ih0, jnp.zeros_like(w_ih0))          # (I, 8H)
    # Per-step additive biases for both layers.
    b_add = _interleave_gates(b0, b1).reshape(1, 8 * H)              # (1, 8H)
    # Fused recurrent weight; LHS layout [h0 | h1].
    l0_part = jnp.concatenate([w_hh0, jnp.zeros((H, 4 * H), jnp.float32)], axis=0)  # (2H,4H)
    l1_part = jnp.concatenate([w_ih1, w_hh1], axis=0)                               # (2H,4H)
    w_fused = _interleave_gates(l0_part, l1_part)                                   # (2H,8H)
    # Epilogue (layer-1 last step) weights, plain [i f g o] layout.
    w_ep = l1_part                                                   # (2H, 4H)
    b1_ep = b1.reshape(1, 4 * H)                                     # (1, 4H)

    # fc weights padded to a lane-dense 128-wide output block.
    w_fc_pad = jnp.zeros((H, OUT_LANES), jnp.float32).at[:, :NUM_CLASSES].set(params["w_fc"])
    b_fc_pad = jnp.zeros((1, OUT_LANES), jnp.float32).at[0, :NUM_CLASSES].set(params["b_fc"])

    # x: (B,T,I) -> time-major, batch padded to Bp sublanes, flattened.
    xt = jnp.transpose(x, (1, 0, 2))                                 # (T, B, I)
    xp = jnp.zeros((T, Bp, I), jnp.float32).at[:, :B, :].set(xt)
    xp = xp.reshape(T * Bp, I)                                       # (T*Bp, I)

    vmem = pl.BlockSpec(memory_space=pltpu.MemorySpace.VMEM)
    args = (xp, w_xin, b_add, w_fused, w_ep, b1_ep, w_fc_pad, b_fc_pad)
    kernel = partial(lstm_fc_kernel, batch_padded=Bp, seq_len=T)
    out_pad = pl.pallas_call(
        kernel,
        out_shape=jax.ShapeDtypeStruct((Bp, OUT_LANES), jnp.float32),
        in_specs=[vmem] * len(args),
        out_specs=vmem,
    )(*args)
    return out_pad[:B, :NUM_CLASSES]


def init_params(key):
    """Deterministic init matching PyTorch LSTM/Linear parameter shapes.

    PyTorch shapes:
      weight_ih_l0: (4H, I),  weight_hh_l0: (4H, H), bias_ih_l0/bias_hh_l0: (4H,)
      weight_ih_l1: (4H, H),  weight_hh_l1: (4H, H), bias_ih_l1/bias_hh_l1: (4H,)
      fc.weight: (num_classes, H), fc.bias: (num_classes,)
    Stored here in canonical (pre-transposed, bias-folded) form; all
    kernel-specific scaling/interleaving happens in lstm_model_forward.
    """
    H, I, C = HIDDEN_SIZE, INPUT_SIZE, NUM_CLASSES
    ks = jax.random.split(key, 10)
    bound = 1.0 / jnp.sqrt(H)

    def u(k, shape):
        return jax.random.uniform(k, shape, jnp.float32, -bound, bound)

    w_ih0 = u(ks[0], (4 * H, I))
    w_hh0 = u(ks[1], (4 * H, H))
    b_ih0 = u(ks[2], (4 * H,))
    b_hh0 = u(ks[3], (4 * H,))
    w_ih1 = u(ks[4], (4 * H, H))
    w_hh1 = u(ks[5], (4 * H, H))
    b_ih1 = u(ks[6], (4 * H,))
    b_hh1 = u(ks[7], (4 * H,))
    w_fc = u(ks[8], (C, H))
    b_fc = u(ks[9], (C,))

    return {
        "w_ih0": w_ih0.T,          # (I, 4H)
        "w_hh0": w_hh0.T,          # (H, 4H)
        "b0": b_ih0 + b_hh0,       # (4H,)
        "w_ih1": w_ih1.T,          # (H, 4H)
        "w_hh1": w_hh1.T,          # (H, 4H)
        "b1": b_ih1 + b_hh1,       # (4H,)
        "w_fc": w_fc.T,            # (H, C)
        "b_fc": b_fc,              # (C,)
    }


def reference_forward(x, params):
    """Pure-JAX reference of the same forward (plain stacked LSTM, no tricks)."""
    H = HIDDEN_SIZE
    B, T, _ = x.shape

    def cell(xt, h, c, W_ih, W_hh, b):
        gates = xt @ W_ih + h @ W_hh + b
        i = jax.nn.sigmoid(gates[:, 0:H])
        f = jax.nn.sigmoid(gates[:, H:2 * H])
        g = jnp.tanh(gates[:, 2 * H:3 * H])
        o = jax.nn.sigmoid(gates[:, 3 * H:4 * H])
        c_new = f * c + i * g
        return o * jnp.tanh(c_new), c_new

    h0 = c0 = h1 = c1 = jnp.zeros((B, H), jnp.float32)
    for t in range(T):
        h0, c0 = cell(x[:, t, :], h0, c0, params["w_ih0"], params["w_hh0"], params["b0"])
        h1, c1 = cell(h0, h1, c1, params["w_ih1"], params["w_hh1"], params["b1"])
    return h1 @ params["w_fc"] + params["b_fc"]


if __name__ == "__main__":
    key = jax.random.PRNGKey(0)
    k_param, k_x = jax.random.split(key)

    batch, seq = 2, 8
    x = jax.random.normal(k_x, (batch, seq, INPUT_SIZE), jnp.float32)
    params = init_params(k_param)

    out = lstm_model_forward(x, params)
    out = jax.block_until_ready(out)

    ref = reference_forward(x, params)
    assert out.shape == (batch, NUM_CLASSES)
    assert jnp.allclose(out, ref, atol=1e-4, rtol=1e-4), (out, ref)

    print("KERNEL_OK")
</pallas_src>

<mosaic_0001>
module attributes {stable_mosaic.version = 11 : i64} {
  func.func @lstm_fc_kernel(%arg0: memref<64x2xf32, #tpu.memory_space<vmem>>, %arg1: memref<2x64xf32, #tpu.memory_space<vmem>>, %arg2: memref<1x64xf32, #tpu.memory_space<vmem>>, %arg3: memref<16x64xf32, #tpu.memory_space<vmem>>, %arg4: memref<16x32xf32, #tpu.memory_space<vmem>>, %arg5: memref<1x32xf32, #tpu.memory_space<vmem>>, %arg6: memref<8x128xf32, #tpu.memory_space<vmem>>, %arg7: memref<1x128xf32, #tpu.memory_space<vmem>>, %arg8: memref<8x128xf32, #tpu.memory_space<vmem>>) attributes {dimension_semantics = [], scalar_prefetch = 0 : i64, scratch_operands = 0 : i64, tpu.core_type = #tpu.core_type<tc>} {
    %c0 = arith.constant 0 : index
    %c0_0 = arith.constant 0 : index
    %0 = vector.load %arg0[%c0, %c0_0] : memref<64x2xf32, #tpu.memory_space<vmem>>, vector<64x2xf32>
    %c0_1 = arith.constant 0 : index
    %c0_2 = arith.constant 0 : index
    %1 = vector.load %arg1[%c0_1, %c0_2] : memref<2x64xf32, #tpu.memory_space<vmem>>, vector<2x64xf32>
    %c0_3 = arith.constant 0 : index
    %c0_4 = arith.constant 0 : index
    %2 = vector.load %arg2[%c0_3, %c0_4] : memref<1x64xf32, #tpu.memory_space<vmem>>, vector<1x64xf32>
    %c0_5 = arith.constant 0 : index
    %c0_6 = arith.constant 0 : index
    %3 = vector.load %arg3[%c0_5, %c0_6] : memref<16x64xf32, #tpu.memory_space<vmem>>, vector<16x64xf32>
    %c0_7 = arith.constant 0 : index
    %c0_8 = arith.constant 0 : index
    %4 = vector.load %arg4[%c0_7, %c0_8] : memref<16x32xf32, #tpu.memory_space<vmem>>, vector<16x32xf32>
    %c0_9 = arith.constant 0 : index
    %c0_10 = arith.constant 0 : index
    %5 = vector.load %arg5[%c0_9, %c0_10] : memref<1x32xf32, #tpu.memory_space<vmem>>, vector<1x32xf32>
    %c0_11 = arith.constant 0 : index
    %c0_12 = arith.constant 0 : index
    %6 = vector.load %arg6[%c0_11, %c0_12] : memref<8x128xf32, #tpu.memory_space<vmem>>, vector<8x128xf32>
    %c0_13 = arith.constant 0 : index
    %c0_14 = arith.constant 0 : index
    %7 = vector.load %arg7[%c0_13, %c0_14] : memref<1x128xf32, #tpu.memory_space<vmem>>, vector<1x128xf32>
    %cst = arith.constant dense<0.000000e+00> : vector<64x64xf32>
    %8 = tpu.matmul %0, %1, %cst {dimension_numbers = #tpu.dot_dimension_numbers<[1], [0], [0], [1], [0, 0, 1, 1], [], []>} : vector<64x2xf32>, vector<2x64xf32>, vector<64x64xf32> -> vector<64x64xf32>
    %9 = vector.broadcast %2 : vector<1x64xf32> to vector<64x64xf32>
    %10 = arith.addf %8, %9 : vector<64x64xf32>
    %11 = tpu.iota {dimensions = array<i32: 1>} : vector<8x64xi32>
    %c32_i32 = arith.constant 32 : i32
    %12 = vector.broadcast %c32_i32 : i32 to vector<8x64xi32>
    %13 = arith.cmpi sge, %11, %12 : vector<8x64xi32>
    %c48_i32 = arith.constant 48 : i32
    %14 = vector.broadcast %c48_i32 : i32 to vector<8x64xi32>
    %15 = arith.cmpi slt, %11, %14 : vector<8x64xi32>
    %16 = arith.andi %13, %15 : vector<8x64xi1>
    %17 = tpu.iota {dimensions = array<i32: 1>} : vector<8x32xi32>
    %c16_i32 = arith.constant 16 : i32
    %18 = vector.broadcast %c16_i32 : i32 to vector<8x32xi32>
    %19 = arith.cmpi sge, %17, %18 : vector<8x32xi32>
    %c24_i32 = arith.constant 24 : i32
    %20 = vector.broadcast %c24_i32 : i32 to vector<8x32xi32>
    %21 = arith.cmpi slt, %17, %20 : vector<8x32xi32>
    %22 = arith.andi %19, %21 : vector<8x32xi1>
    %23 = tpu.iota {dimensions = array<i32: 1>} : vector<8x16xi32>
    %c8_i32 = arith.constant 8 : i32
    %24 = vector.broadcast %c8_i32 : i32 to vector<8x16xi32>
    %25 = arith.cmpi slt, %23, %24 : vector<8x16xi32>
    %cst_15 = arith.constant 0.000000e+00 : f32
    %26 = vector.broadcast %cst_15 : f32 to vector<8x16xf32>
    %27 = vector.extract_strided_slice %10 {offsets = [0, 0], sizes = [8, 64], strides = [1, 1]} : vector<64x64xf32> to vector<8x64xf32>
    %28 = math.tanh %27 : vector<8x64xf32>
    %cst_16 = arith.constant 5.000000e-01 : f32
    %29 = vector.broadcast %cst_16 : f32 to vector<8x64xf32>
    %30 = arith.mulf %29, %28 : vector<8x64xf32>
    %cst_17 = arith.constant 5.000000e-01 : f32
    %31 = vector.broadcast %cst_17 : f32 to vector<8x64xf32>
    %32 = arith.addf %30, %31 : vector<8x64xf32>
    %33 = arith.select %16, %28, %32 : vector<8x64xi1>, vector<8x64xf32>
    %34 = vector.extract_strided_slice %33 {offsets = [0, 0], sizes = [8, 16], strides = [1, 1]} : vector<8x64xf32> to vector<8x16xf32>
    %35 = vector.extract_strided_slice %33 {offsets = [0, 16], sizes = [8, 16], strides = [1, 1]} : vector<8x64xf32> to vector<8x16xf32>
    %36 = vector.extract_strided_slice %33 {offsets = [0, 32], sizes = [8, 16], strides = [1, 1]} : vector<8x64xf32> to vector<8x16xf32>
    %37 = vector.extract_strided_slice %33 {offsets = [0, 48], sizes = [8, 16], strides = [1, 1]} : vector<8x64xf32> to vector<8x16xf32>
    %38 = arith.mulf %35, %26 : vector<8x16xf32>
    %39 = arith.mulf %34, %36 : vector<8x16xf32>
    %40 = arith.addf %38, %39 : vector<8x16xf32>
    %41 = math.tanh %40 : vector<8x16xf32>
    %42 = arith.mulf %37, %41 : vector<8x16xf32>
    %cst_18 = arith.constant 0.000000e+00 : f32
    %43 = vector.broadcast %cst_18 : f32 to vector<8x16xf32>
    %44 = arith.select %25, %42, %43 : vector<8x16xi1>, vector<8x16xf32>
    %cst_19 = arith.constant 0.000000e+00 : f32
    %45 = vector.broadcast %cst_19 : f32 to vector<8x16xf32>
    %46 = arith.select %25, %40, %45 : vector<8x16xi1>, vector<8x16xf32>
    %47 = vector.extract_strided_slice %10 {offsets = [8, 0], sizes = [8, 64], strides = [1, 1]} : vector<64x64xf32> to vector<8x64xf32>
    %cst_20 = arith.constant dense<0.000000e+00> : vector<8x64xf32>
    %48 = tpu.matmul %44, %3, %cst_20 {dimension_numbers = #tpu.dot_dimension_numbers<[1], [0], [0], [1], [0, 0, 1, 1], [], []>} : vector<8x16xf32>, vector<16x64xf32>, vector<8x64xf32> -> vector<8x64xf32>
    %49 = arith.addf %47, %48 : vector<8x64xf32>
    %50 = math.tanh %49 : vector<8x64xf32>
    %cst_21 = arith.constant 5.000000e-01 : f32
    %51 = vector.broadcast %cst_21 : f32 to vector<8x64xf32>
    %52 = arith.mulf %51, %50 : vector<8x64xf32>
    %cst_22 = arith.constant 5.000000e-01 : f32
    %53 = vector.broadcast %cst_22 : f32 to vector<8x64xf32>
    %54 = arith.addf %52, %53 : vector<8x64xf32>
    %55 = arith.select %16, %50, %54 : vector<8x64xi1>, vector<8x64xf32>
    %56 = vector.extract_strided_slice %55 {offsets = [0, 0], sizes = [8, 16], strides = [1, 1]} : vector<8x64xf32> to vector<8x16xf32>
    %57 = vector.extract_strided_slice %55 {offsets = [0, 16], sizes = [8, 16], strides = [1, 1]} : vector<8x64xf32> to vector<8x16xf32>
    %58 = vector.extract_strided_slice %55 {offsets = [0, 32], sizes = [8, 16], strides = [1, 1]} : vector<8x64xf32> to vector<8x16xf32>
    %59 = vector.extract_strided_slice %55 {offsets = [0, 48], sizes = [8, 16], strides = [1, 1]} : vector<8x64xf32> to vector<8x16xf32>
    %60 = arith.mulf %57, %46 : vector<8x16xf32>
    %61 = arith.mulf %56, %58 : vector<8x16xf32>
    %62 = arith.addf %60, %61 : vector<8x16xf32>
    %63 = math.tanh %62 : vector<8x16xf32>
    %64 = arith.mulf %59, %63 : vector<8x16xf32>
    %65 = vector.extract_strided_slice %10 {offsets = [16, 0], sizes = [8, 64], strides = [1, 1]} : vector<64x64xf32> to vector<8x64xf32>
    %cst_23 = arith.constant dense<0.000000e+00> : vector<8x64xf32>
    %66 = tpu.matmul %64, %3, %cst_23 {dimension_numbers = #tpu.dot_dimension_numbers<[1], [0], [0], [1], [0, 0, 1, 1], [], []>} : vector<8x16xf32>, vector<16x64xf32>, vector<8x64xf32> -> vector<8x64xf32>
    %67 = arith.addf %65, %66 : vector<8x64xf32>
    %68 = math.tanh %67 : vector<8x64xf32>
    %cst_24 = arith.constant 5.000000e-01 : f32
    %69 = vector.broadcast %cst_24 : f32 to vector<8x64xf32>
    %70 = arith.mulf %69, %68 : vector<8x64xf32>
    %cst_25 = arith.constant 5.000000e-01 : f32
    %71 = vector.broadcast %cst_25 : f32 to vector<8x64xf32>
    %72 = arith.addf %70, %71 : vector<8x64xf32>
    %73 = arith.select %16, %68, %72 : vector<8x64xi1>, vector<8x64xf32>
    %74 = vector.extract_strided_slice %73 {offsets = [0, 0], sizes = [8, 16], strides = [1, 1]} : vector<8x64xf32> to vector<8x16xf32>
    %75 = vector.extract_strided_slice %73 {offsets = [0, 16], sizes = [8, 16], strides = [1, 1]} : vector<8x64xf32> to vector<8x16xf32>
    %76 = vector.extract_strided_slice %73 {offsets = [0, 32], sizes = [8, 16], strides = [1, 1]} : vector<8x64xf32> to vector<8x16xf32>
    %77 = vector.extract_strided_slice %73 {offsets = [0, 48], sizes = [8, 16], strides = [1, 1]} : vector<8x64xf32> to vector<8x16xf32>
    %78 = arith.mulf %75, %62 : vector<8x16xf32>
    %79 = arith.mulf %74, %76 : vector<8x16xf32>
    %80 = arith.addf %78, %79 : vector<8x16xf32>
    %81 = math.tanh %80 : vector<8x16xf32>
    %82 = arith.mulf %77, %81 : vector<8x16xf32>
    %83 = vector.extract_strided_slice %10 {offsets = [24, 0], sizes = [8, 64], strides = [1, 1]} : vector<64x64xf32> to vector<8x64xf32>
    %cst_26 = arith.constant dense<0.000000e+00> : vector<8x64xf32>
    %84 = tpu.matmul %82, %3, %cst_26 {dimension_numbers = #tpu.dot_dimension_numbers<[1], [0], [0], [1], [0, 0, 1, 1], [], []>} : vector<8x16xf32>, vector<16x64xf32>, vector<8x64xf32> -> vector<8x64xf32>
    %85 = arith.addf %83, %84 : vector<8x64xf32>
    %86 = math.tanh %85 : vector<8x64xf32>
    %cst_27 = arith.constant 5.000000e-01 : f32
    %87 = vector.broadcast %cst_27 : f32 to vector<8x64xf32>
    %88 = arith.mulf %87, %86 : vector<8x64xf32>
    %cst_28 = arith.constant 5.000000e-01 : f32
    %89 = vector.broadcast %cst_28 : f32 to vector<8x64xf32>
    %90 = arith.addf %88, %89 : vector<8x64xf32>
    %91 = arith.select %16, %86, %90 : vector<8x64xi1>, vector<8x64xf32>
    %92 = vector.extract_strided_slice %91 {offsets = [0, 0], sizes = [8, 16], strides = [1, 1]} : vector<8x64xf32> to vector<8x16xf32>
    %93 = vector.extract_strided_slice %91 {offsets = [0, 16], sizes = [8, 16], strides = [1, 1]} : vector<8x64xf32> to vector<8x16xf32>
    %94 = vector.extract_strided_slice %91 {offsets = [0, 32], sizes = [8, 16], strides = [1, 1]} : vector<8x64xf32> to vector<8x16xf32>
    %95 = vector.extract_strided_slice %91 {offsets = [0, 48], sizes = [8, 16], strides = [1, 1]} : vector<8x64xf32> to vector<8x16xf32>
    %96 = arith.mulf %93, %80 : vector<8x16xf32>
    %97 = arith.mulf %92, %94 : vector<8x16xf32>
    %98 = arith.addf %96, %97 : vector<8x16xf32>
    %99 = math.tanh %98 : vector<8x16xf32>
    %100 = arith.mulf %95, %99 : vector<8x16xf32>
    %101 = vector.extract_strided_slice %10 {offsets = [32, 0], sizes = [8, 64], strides = [1, 1]} : vector<64x64xf32> to vector<8x64xf32>
    %cst_29 = arith.constant dense<0.000000e+00> : vector<8x64xf32>
    %102 = tpu.matmul %100, %3, %cst_29 {dimension_numbers = #tpu.dot_dimension_numbers<[1], [0], [0], [1], [0, 0, 1, 1], [], []>} : vector<8x16xf32>, vector<16x64xf32>, vector<8x64xf32> -> vector<8x64xf32>
    %103 = arith.addf %101, %102 : vector<8x64xf32>
    %104 = math.tanh %103 : vector<8x64xf32>
    %cst_30 = arith.constant 5.000000e-01 : f32
    %105 = vector.broadcast %cst_30 : f32 to vector<8x64xf32>
    %106 = arith.mulf %105, %104 : vector<8x64xf32>
    %cst_31 = arith.constant 5.000000e-01 : f32
    %107 = vector.broadcast %cst_31 : f32 to vector<8x64xf32>
    %108 = arith.addf %106, %107 : vector<8x64xf32>
    %109 = arith.select %16, %104, %108 : vector<8x64xi1>, vector<8x64xf32>
    %110 = vector.extract_strided_slice %109 {offsets = [0, 0], sizes = [8, 16], strides = [1, 1]} : vector<8x64xf32> to vector<8x16xf32>
    %111 = vector.extract_strided_slice %109 {offsets = [0, 16], sizes = [8, 16], strides = [1, 1]} : vector<8x64xf32> to vector<8x16xf32>
    %112 = vector.extract_strided_slice %109 {offsets = [0, 32], sizes = [8, 16], strides = [1, 1]} : vector<8x64xf32> to vector<8x16xf32>
    %113 = vector.extract_strided_slice %109 {offsets = [0, 48], sizes = [8, 16], strides = [1, 1]} : vector<8x64xf32> to vector<8x16xf32>
    %114 = arith.mulf %111, %98 : vector<8x16xf32>
    %115 = arith.mulf %110, %112 : vector<8x16xf32>
    %116 = arith.addf %114, %115 : vector<8x16xf32>
    %117 = math.tanh %116 : vector<8x16xf32>
    %118 = arith.mulf %113, %117 : vector<8x16xf32>
    %119 = vector.extract_strided_slice %10 {offsets = [40, 0], sizes = [8, 64], strides = [1, 1]} : vector<64x64xf32> to vector<8x64xf32>
    %cst_32 = arith.constant dense<0.000000e+00> : vector<8x64xf32>
    %120 = tpu.matmul %118, %3, %cst_32 {dimension_numbers = #tpu.dot_dimension_numbers<[1], [0], [0], [1], [0, 0, 1, 1], [], []>} : vector<8x16xf32>, vector<16x64xf32>, vector<8x64xf32> -> vector<8x64xf32>
    %121 = arith.addf %119, %120 : vector<8x64xf32>
    %122 = math.tanh %121 : vector<8x64xf32>
    %cst_33 = arith.constant 5.000000e-01 : f32
    %123 = vector.broadcast %cst_33 : f32 to vector<8x64xf32>
    %124 = arith.mulf %123, %122 : vector<8x64xf32>
    %cst_34 = arith.constant 5.000000e-01 : f32
    %125 = vector.broadcast %cst_34 : f32 to vector<8x64xf32>
    %126 = arith.addf %124, %125 : vector<8x64xf32>
    %127 = arith.select %16, %122, %126 : vector<8x64xi1>, vector<8x64xf32>
    %128 = vector.extract_strided_slice %127 {offsets = [0, 0], sizes = [8, 16], strides = [1, 1]} : vector<8x64xf32> to vector<8x16xf32>
    %129 = vector.extract_strided_slice %127 {offsets = [0, 16], sizes = [8, 16], strides = [1, 1]} : vector<8x64xf32> to vector<8x16xf32>
    %130 = vector.extract_strided_slice %127 {offsets = [0, 32], sizes = [8, 16], strides = [1, 1]} : vector<8x64xf32> to vector<8x16xf32>
    %131 = vector.extract_strided_slice %127 {offsets = [0, 48], sizes = [8, 16], strides = [1, 1]} : vector<8x64xf32> to vector<8x16xf32>
    %132 = arith.mulf %129, %116 : vector<8x16xf32>
    %133 = arith.mulf %128, %130 : vector<8x16xf32>
    %134 = arith.addf %132, %133 : vector<8x16xf32>
    %135 = math.tanh %134 : vector<8x16xf32>
    %136 = arith.mulf %131, %135 : vector<8x16xf32>
    %137 = vector.extract_strided_slice %10 {offsets = [48, 0], sizes = [8, 64], strides = [1, 1]} : vector<64x64xf32> to vector<8x64xf32>
    %cst_35 = arith.constant dense<0.000000e+00> : vector<8x64xf32>
    %138 = tpu.matmul %136, %3, %cst_35 {dimension_numbers = #tpu.dot_dimension_numbers<[1], [0], [0], [1], [0, 0, 1, 1], [], []>} : vector<8x16xf32>, vector<16x64xf32>, vector<8x64xf32> -> vector<8x64xf32>
    %139 = arith.addf %137, %138 : vector<8x64xf32>
    %140 = math.tanh %139 : vector<8x64xf32>
    %cst_36 = arith.constant 5.000000e-01 : f32
    %141 = vector.broadcast %cst_36 : f32 to vector<8x64xf32>
    %142 = arith.mulf %141, %140 : vector<8x64xf32>
    %cst_37 = arith.constant 5.000000e-01 : f32
    %143 = vector.broadcast %cst_37 : f32 to vector<8x64xf32>
    %144 = arith.addf %142, %143 : vector<8x64xf32>
    %145 = arith.select %16, %140, %144 : vector<8x64xi1>, vector<8x64xf32>
    %146 = vector.extract_strided_slice %145 {offsets = [0, 0], sizes = [8, 16], strides = [1, 1]} : vector<8x64xf32> to vector<8x16xf32>
    %147 = vector.extract_strided_slice %145 {offsets = [0, 16], sizes = [8, 16], strides = [1, 1]} : vector<8x64xf32> to vector<8x16xf32>
    %148 = vector.extract_strided_slice %145 {offsets = [0, 32], sizes = [8, 16], strides = [1, 1]} : vector<8x64xf32> to vector<8x16xf32>
    %149 = vector.extract_strided_slice %145 {offsets = [0, 48], sizes = [8, 16], strides = [1, 1]} : vector<8x64xf32> to vector<8x16xf32>
    %150 = arith.mulf %147, %134 : vector<8x16xf32>
    %151 = arith.mulf %146, %148 : vector<8x16xf32>
    %152 = arith.addf %150, %151 : vector<8x16xf32>
    %153 = math.tanh %152 : vector<8x16xf32>
    %154 = arith.mulf %149, %153 : vector<8x16xf32>
    %155 = vector.extract_strided_slice %10 {offsets = [56, 0], sizes = [8, 64], strides = [1, 1]} : vector<64x64xf32> to vector<8x64xf32>
    %cst_38 = arith.constant dense<0.000000e+00> : vector<8x64xf32>
    %156 = tpu.matmul %154, %3, %cst_38 {dimension_numbers = #tpu.dot_dimension_numbers<[1], [0], [0], [1], [0, 0, 1, 1], [], []>} : vector<8x16xf32>, vector<16x64xf32>, vector<8x64xf32> -> vector<8x64xf32>
    %157 = arith.addf %155, %156 : vector<8x64xf32>
    %158 = math.tanh %157 : vector<8x64xf32>
    %cst_39 = arith.constant 5.000000e-01 : f32
    %159 = vector.broadcast %cst_39 : f32 to vector<8x64xf32>
    %160 = arith.mulf %159, %158 : vector<8x64xf32>
    %cst_40 = arith.constant 5.000000e-01 : f32
    %161 = vector.broadcast %cst_40 : f32 to vector<8x64xf32>
    %162 = arith.addf %160, %161 : vector<8x64xf32>
    %163 = arith.select %16, %158, %162 : vector<8x64xi1>, vector<8x64xf32>
    %164 = vector.extract_strided_slice %163 {offsets = [0, 0], sizes = [8, 16], strides = [1, 1]} : vector<8x64xf32> to vector<8x16xf32>
    %165 = vector.extract_strided_slice %163 {offsets = [0, 16], sizes = [8, 16], strides = [1, 1]} : vector<8x64xf32> to vector<8x16xf32>
    %166 = vector.extract_strided_slice %163 {offsets = [0, 32], sizes = [8, 16], strides = [1, 1]} : vector<8x64xf32> to vector<8x16xf32>
    %167 = vector.extract_strided_slice %163 {offsets = [0, 48], sizes = [8, 16], strides = [1, 1]} : vector<8x64xf32> to vector<8x16xf32>
    %168 = arith.mulf %165, %152 : vector<8x16xf32>
    %169 = arith.mulf %164, %166 : vector<8x16xf32>
    %170 = arith.addf %168, %169 : vector<8x16xf32>
    %171 = math.tanh %170 : vector<8x16xf32>
    %172 = arith.mulf %167, %171 : vector<8x16xf32>
    %cst_41 = arith.constant dense<0.000000e+00> : vector<8x32xf32>
    %173 = tpu.matmul %172, %4, %cst_41 {dimension_numbers = #tpu.dot_dimension_numbers<[1], [0], [0], [1], [0, 0, 1, 1], [], []>} : vector<8x16xf32>, vector<16x32xf32>, vector<8x32xf32> -> vector<8x32xf32>
    %174 = vector.broadcast %5 : vector<1x32xf32> to vector<8x32xf32>
    %175 = arith.addf %173, %174 : vector<8x32xf32>
    %176 = math.tanh %175 : vector<8x32xf32>
    %cst_42 = arith.constant 5.000000e-01 : f32
    %177 = vector.broadcast %cst_42 : f32 to vector<8x32xf32>
    %178 = arith.mulf %177, %176 : vector<8x32xf32>
    %cst_43 = arith.constant 5.000000e-01 : f32
    %179 = vector.broadcast %cst_43 : f32 to vector<8x32xf32>
    %180 = arith.addf %178, %179 : vector<8x32xf32>
    %181 = arith.select %22, %176, %180 : vector<8x32xi1>, vector<8x32xf32>
    %182 = vector.extract_strided_slice %170 {offsets = [0, 8], sizes = [8, 8], strides = [1, 1]} : vector<8x16xf32> to vector<8x8xf32>
    %183 = vector.extract_strided_slice %181 {offsets = [0, 0], sizes = [8, 8], strides = [1, 1]} : vector<8x32xf32> to vector<8x8xf32>
    %184 = vector.extract_strided_slice %181 {offsets = [0, 8], sizes = [8, 8], strides = [1, 1]} : vector<8x32xf32> to vector<8x8xf32>
    %185 = vector.extract_strided_slice %181 {offsets = [0, 16], sizes = [8, 8], strides = [1, 1]} : vector<8x32xf32> to vector<8x8xf32>
    %186 = vector.extract_strided_slice %181 {offsets = [0, 24], sizes = [8, 8], strides = [1, 1]} : vector<8x32xf32> to vector<8x8xf32>
    %187 = arith.mulf %184, %182 : vector<8x8xf32>
    %188 = arith.mulf %183, %185 : vector<8x8xf32>
    %189 = arith.addf %187, %188 : vector<8x8xf32>
    %190 = math.tanh %189 : vector<8x8xf32>
    %191 = arith.mulf %186, %190 : vector<8x8xf32>
    %cst_44 = arith.constant dense<0.000000e+00> : vector<8x128xf32>
    %192 = tpu.matmul %191, %6, %cst_44 {dimension_numbers = #tpu.dot_dimension_numbers<[1], [0], [0], [1], [0, 0, 1, 1], [], []>} : vector<8x8xf32>, vector<8x128xf32>, vector<8x128xf32> -> vector<8x128xf32>
    %193 = vector.broadcast %7 : vector<1x128xf32> to vector<8x128xf32>
    %194 = arith.addf %192, %193 : vector<8x128xf32>
    %c0_45 = arith.constant 0 : index
    %c0_46 = arith.constant 0 : index
    %195 = vector.load %arg8[%c0_45, %c0_46] : memref<8x128xf32, #tpu.memory_space<vmem>>, vector<8x128xf32>
    tpu.vector_store %arg8[%c0_45, %c0_46], %194 {strides = array<i32>} : memref<8x128xf32, #tpu.memory_space<vmem>>, vector<8x128xf32>,
    return
  }
}

</mosaic_0001>

<bundles_post_ra>
// kernel: tpu_custom_call.1
= control target key start
LH: loop header
LB: loop body
LE: loop exit
PB: predicated region body
PF: predicated region fallthrough
CT: control target
= control target key end

     0   :  { %vm78_vm0 = vcmask 1041408   ;;  %vm53_vm1 = vcmask 15360   ;;  %s1583_s0 = inlined_call_operand.vmem [shape: f32[64,2], index: 0, kind: input, shape index: {}]   ;;  %s1584_s1 = inlined_call_operand.vmem [shape: f32[2,64], index: 1, kind: input, shape index: {}]   ;;  %s1585_s2 = inlined_call_operand.vmem [shape: f32[1,64], index: 2, kind: input, shape index: {}]   ;;  %s1586_s3 = inlined_call_operand.vmem [shape: f32[16,64], index: 3, kind: input, shape index: {}]   ;;  %s1587_s4 = inlined_call_operand.vmem [shape: f32[16,32], index: 4, kind: input, shape index: {}]   ;;  %s1588_s5 = inlined_call_operand.vmem [shape: f32[1,32], index: 5, kind: input, shape index: {}]   ;;  %s1589_s6 = inlined_call_operand.vmem [shape: f32[8,128], index: 6, kind: input, shape index: {}]   ;;  %s1590_s7 = inlined_call_operand.vmem [shape: f32[1,128], index: 7, kind: input, shape index: {}]   ;;  %s1591_s8 = inlined_call_operand.hbm [shape: f32[8,128], index: 8, kind: output, shape index: {}]  }
   0x1   :  { %v38_v0 = vld [vmem:[%s1584_s1] sm:$0x3]  ;;  %v31_v2 = vld [vmem:[%s1583_s0 + $0x8] sm:$0xff] }
   0x2   :  { %v30_v1 = vld [vmem:[%s1583_s0] sm:$0xff]  ;;  %1168 = vmatprep.subr.msk.mxu0 %vm78_vm0, %v38_v0 }
   0x3   :  { %1170 = vmatprep.mubr.msk.f32.mxu0 %vm53_vm1, %v30_v1 }
   0x4   :  { %13 = vsyncpa [#allocation3], 0  ;;  %1169 = vmatpush3.msk.msra.mxu0 %vm78_vm0, %v38_v0  ;;  %v1408_v3 = vld [vmem:[%s1585_s2] ss:$0 sm:$0xff]  ;;  %v187_v7 = vlaneseq  ;;  %s1338_s1 = smov 96   ;;  %s1339_s2 = smov 16  }
   0x5   :  { %1171 = vmatmul.mubr.msk.f32.vlgmr.msra.gmra.mrb[0].mxu0 %vm53_vm1, %v31_v2  ;;  %s1340_s13 = smov 112   ;;  %s1341_s14 = smov 32   ;;  %v40_v20 = vld [vmem:[%s1586_s3] sm:$0xff]  ;;  %v41_v21 = vld [vmem:[%s1586_s3 + $0x8] sm:$0xff]  ;;  %v1342_v22 = vmov 0.0|0.0   ;;  %vm1343_vm6 = vmmov 0  }
   0x6   :  { %v1411_v8 = vand.u32 127, %v187_v7  ;;  %1243 = vmatprep.subr.bf16.mxu1 %v1342_v22  ;;  %v1432_v23 = vpack.c.bf16 %v41_v21, %v40_v20  ;;  %1255 = vmatprep.subr.bf16.mxu0 %v1342_v22  ;;  %v1344_v26 = vmov 0.0   ;;  %s1345_s3 = smov 80   ;;  %vm227_vm7 = vcmask 130048   ;;  %v32_v45 = vld [vmem:[%s1583_s0 + $0x10] sm:$0xff]  ;;  %v33_v46 = vld [vmem:[%s1583_s0 + $0x18] sm:$0xff] }
   0x7   :  { %1186 = vmatprep.mubr.msk.f32.mxu1 %vm1343_vm6, %v1344_v26  ;;  %1173 = vmatprep.mubr.msk.f32.mxu0 %vm53_vm1, %v32_v45  ;;  %v36_v45 = vld [vmem:[%s1583_s0 + $0x30] sm:$0xff]  ;;  %vm1024_vm11 = vcmask 64512   ;;  %s1348_s17 = smov [#allocation2]  }
   0x8   :  { %vm189_vm2 = vcmp.ge.s32.totalorder %v1411_v8, 32  ;;  %vm190_vm3 = vcmp.lt.s32.totalorder %v1411_v8, 48  ;;  %1245 = vmatpush3.bf16.msra.mxu1 %v1432_v23  ;;  %1257 = vmatpush3.bf16.msra.mxu0 %v1432_v23  ;;  %vm195_vm5 = vcmp.lt.s32.totalorder %v1411_v8, 8  ;;  %vm192_vm8 = vcmp.ge.s32.totalorder %v1411_v8, 16  ;;  %s1104_s18 = sshll.u32 %s1348_s17, 4  ;;  %s1105_s18 = int_to_ptr.vmem [resolvable:$true] %s1104_s18 }
   0x9   :  { %vm1415_vm4 = vmand %vm189_vm2, %vm190_vm3  ;;  %1246 = vmatprep.subr.bf16.mxu1 %v1342_v22  ;;  %1261 = vmatprep.subr.bf16.mxu0 %v1342_v22  ;;  %vm193_vm9 = vcmp.lt.s32.totalorder %v1411_v8, 24  ;;  %v45_v8 = vld [vmem:[%s1589_s6] sm:$0xff]  ;;  %s1314_s6 = scalar_lea.vmem %s1105_s18, 128  ;;  %p1319_p1 = scmp.lt.s32.totalorder %s1105_s18, %s1105_s18 }
   0xa   :  { %1174 = vmatmul.mubr.msk.f32.gmra.mrb[2].mxu0 %vm53_vm1, %v33_v46  ;;  %v37_v46 = vld [vmem:[%s1583_s0 + $0x38] sm:$0xff]  ;;  %vm194_vm10 = vmand %vm192_vm8, %vm193_vm9  ;;  %p1315_p0 = scmp.ne.s32.totalorder %s1105_s18, %s1314_s6  ;;  %p1320_p2 = scmp.lt.s32.totalorder %s1314_s6, %s1314_s6 }
   0xc   :  { %p1321_p3 = por %p1320_p2, %p1319_p1 }
   0xe   :  { %p1322_p4 = pnand %p1321_p3, %p1315_p0 }
  0xd8   :  { %v1172_v4 = vpop.f32.mrb[0].mxu0 }
  0xd9   :  { %v148_v5 = vpop.f32.mrb[1].mxu0  ;;  %v154_v31 = vadd.f32 %v1172_v4, %v1408_v3 }
  0xda   :  { %v149_v6 = vadd.f32 %v1408_v3, %v148_v5 }
  0xdc   :  { %1278 = vtanh.f32 %v149_v6 }
  0xdd   :  { %v1175_v50 = vpop.f32.mrb[2].mxu0 }
  0xde   :  { %v158_v51 = vpop.f32.mrb[3].mxu0  ;;  %v164_v7 = vadd.f32 %v1175_v50, %v1408_v3 }
  0xdf   :  { %v159_v53 = vadd.f32 %v1408_v3, %v158_v51 }
  0xe6   :  { %v1279_v9 = vpop.eup %1278 }
  0xe7   :  { %v197_v10 = vmul.f32 0.5, %v1279_v9 }
  0xe9   :  { %v198_v12 = vadd.f32 0.5, %v197_v10 }
  0xeb   :  { %v199_v13 = vsel %vm1415_vm4, %v1279_v9, %v198_v12 }
  0xec   :  { %202 = vrot.lane.b32.xlu0 %v199_v13, %s1338_s1  ;;  %v200_v16 = vmul.f32 0.0, %v199_v13 }
 0x15e   :  { %v203_v14 = vpop.permute.xlu0 %202 }
 0x15f   :  { %v205_v15 = vmul.f32 %v203_v14, %v199_v13 }
 0x161   :  { %207 = vrot.lane.b32.xlu0 %v205_v15, %s1339_s2 }
 0x1d3   :  { %v208_v17 = vpop.permute.xlu0 %207 }
 0x1d4   :  { %v210_v18 = vadd.f32 %v208_v17, %v200_v16 }
 0x1d6   :  { %1280 = vtanh.f32 %v210_v18  ;;  %223 = vrot.lane.b32.xlu0 %v210_v18, %s1340_s13 }
 0x1e0   :  { %v1281_v19 = vpop.eup %1280 }
 0x1e1   :  { %213 = vrot.lane.b32.xlu1 %v1281_v19, %s1341_s14 }
 0x248   :  { %v224_v24 = vpop.permute.xlu0 %223 }
 0x249   :  { %v226_v25 = vsel %vm195_vm5, %v224_v24, 0.0  ;;  %v34_v24 = vld [vmem:[%s1583_s0 + $0x20] sm:$0xff] }
 0x24a   :  { %307 = vrot.lane.b32.xlu0 %v226_v25, %s1339_s2  ;;  %v35_v25 = vld [vmem:[%s1583_s0 + $0x28] sm:$0xff]  ;;  %1176 = vmatprep.mubr.msk.f32.mxu0 %vm53_vm1, %v34_v24 }
 0x24b   :  { %1177 = vmatmul.mubr.msk.f32.gmra.mrb[4].mxu0 %vm53_vm1, %v35_v25 }
 0x24c   :  { %1179 = vmatprep.mubr.msk.f32.mxu0 %vm53_vm1, %v36_v45 }
 0x24f   :  { %1180 = vmatmul.mubr.msk.f32.gmra.mrb[6].mxu0 %vm53_vm1, %v37_v46 }
 0x250   :  { %1214 = vmatprep.mubr.msk.f32.mxu0 %vm1343_vm6, %v1344_v26 }
 0x253   :  { %v214_v27 = vpop.permute.xlu1 %213 }
 0x254   :  { %v216_v28 = vmul.f32 %v214_v27, %v199_v13 }
 0x256   :  { %218 = vrot.lane.b32.xlu1 %v216_v28, %s1345_s3 }
 0x2bc   :  { %v308_v41 = vpop.permute.xlu0 %307 }
 0x2c8   :  { %v219_v29 = vpop.permute.xlu1 %218 }
 0x2c9   :  { %v221_v30 = vsel %vm195_vm5, %v219_v29, 0.0 }
 0x2ca   :  { %1187 = vmatmul.mubr.msk.f32.vlgmr.msra.gmra.mrb[0].mxu1 %vm227_vm7, %v221_v30 }
 0x2cb   :  { %1248 = vmatpush3.bf16.msra.mxu1 %v1432_v23  ;;  %1193 = vmatprep.mubr.msk.f32.mxu1 %vm1343_vm6, %v1344_v26 }
 0x2cc   :  { %1249 = vmatprep.subr.bf16.mxu1 %v1342_v22 }
 0x31e   :  { %v1178_v30 = vpop.f32.mrb[4].mxu0 }
 0x39d   :  { %v297_v32 = vpop.f32.mrb[0].mxu1 }
 0x39e   :  { %v301_v33 = vadd.f32 %v297_v32, %v154_v31  ;;  %v1188_v34 = vpop.f32.mrb[1].mxu1  ;;  %v168_v31 = vpop.f32.mrb[5].mxu0 }
 0x39f   :  { %v1181_v50 = vpop.f32.mrb[6].mxu0 }
 0x3a0   :  { %1282 = vtanh.f32 %v301_v33  ;;  %v169_v33 = vadd.f32 %v1408_v3, %v168_v31  ;;  %v178_v51 = vpop.f32.mrb[7].mxu0 }
 0x3aa   :  { %v1283_v35 = vpop.eup %1282 }
 0x3ab   :  { %v303_v36 = vmul.f32 0.5, %v1283_v35 }
 0x3ad   :  { %v304_v37 = vadd.f32 0.5, %v303_v36 }
 0x3af   :  { %v305_v38 = vsel %vm1415_vm4, %v1283_v35, %v304_v37 }
 0x3b0   :  { %312 = vrot.lane.b32.xlu1 %v305_v38, %s1338_s1  ;;  %v310_v42 = vmul.f32 %v308_v41, %v305_v38 }
 0x422   :  { %v313_v39 = vpop.permute.xlu1 %312 }
 0x423   :  { %v315_v40 = vmul.f32 %v313_v39, %v305_v38 }
 0x425   :  { %317 = vrot.lane.b32.xlu1 %v315_v40, %s1339_s2 }
 0x497   :  { %v318_v43 = vpop.permute.xlu1 %317 }
 0x498   :  { %v320_v44 = vadd.f32 %v318_v43, %v310_v42 }
 0x49a   :  { %1284 = vtanh.f32 %v320_v44 }
 0x4a4   :  { %v1285_v47 = vpop.eup %1284 }
 0x4a5   :  { %323 = vrot.lane.b32.xlu0 %v1285_v47, %s1341_s14 }
 0x517   :  { %v324_v48 = vpop.permute.xlu0 %323 }
 0x518   :  { %v326_v49 = vmul.f32 %v324_v48, %v305_v38 }
 0x51a   :  { %328 = vrot.lane.b32.xlu1 %v326_v49, %s1345_s3 }
 0x58c   :  { %v329_v52 = vpop.permute.xlu1 %328 }
 0x58d   :  { %1194 = vmatmul.mubr.msk.f32.vlgmr.msra.gmra.mrb[2].mxu1 %vm227_vm7, %v329_v52 }
 0x58e   :  { %1251 = vmatpush3.bf16.msra.mxu1 %v1432_v23  ;;  %1200 = vmatprep.mubr.msk.f32.mxu1 %vm1343_vm6, %v1344_v26 }
 0x58f   :  { %1252 = vmatprep.subr.bf16.mxu1 %v1342_v22 }
 0x660   :  { %v398_v54 = vpop.f32.mrb[2].mxu1 }
 0x661   :  { %v402_v55 = vadd.f32 %v398_v54, %v159_v53  ;;  %v1195_v56 = vpop.f32.mrb[3].mxu1  ;;  %v174_v53 = vadd.f32 %v1178_v30, %v1408_v3 }
 0x663   :  { %1286 = vtanh.f32 %v402_v55 }
 0x66d   :  { %v1287_v57 = vpop.eup %1286 }
 0x66e   :  { %v404_v58 = vmul.f32 0.5, %v1287_v57 }
 0x670   :  { %v405_v59 = vadd.f32 0.5, %v404_v58 }
 0x672   :  { %v406_v60 = vsel %vm1415_vm4, %v1287_v57, %v405_v59 }
 0x673   :  { %409 = vrot.lane.b32.xlu0 %v406_v60, %s1338_s1  ;;  %v407_v63 = vmul.f32 %v406_v60, %v320_v44 }
 0x6e5   :  { %v410_v61 = vpop.permute.xlu0 %409 }
 0x6e6   :  { %v412_v62 = vmul.f32 %v410_v61, %v406_v60 }
 0x6e8   :  { %414 = vrot.lane.b32.xlu1 %v412_v62, %s1339_s2 }
 0x75a   :  { %v415_v0 = vpop.permute.xlu1 %414 }
 0x75b   :  { %v417_v1 = vadd.f32 %v415_v0, %v407_v63 }
 0x75d   :  { %1288 = vtanh.f32 %v417_v1 }
 0x767   :  { %v1289_v2 = vpop.eup %1288 }
 0x768   :  { %420 = vrot.lane.b32.xlu0 %v1289_v2, %s1341_s14 }
 0x7da   :  { %v421_v4 = vpop.permute.xlu0 %420 }
 0x7db   :  { %v423_v5 = vmul.f32 %v421_v4, %v406_v60 }
 0x7dd   :  { %425 = vrot.lane.b32.xlu1 %v423_v5, %s1345_s3 }
 0x84f   :  { %v426_v6 = vpop.permute.xlu1 %425 }
 0x850   :  { %1201 = vmatmul.mubr.msk.f32.vlgmr.msra.gmra.mrb[4].mxu1 %vm227_vm7, %v426_v6  ;;  %v179_v6 = vadd.f32 %v1408_v3, %v178_v51 }
 0x851   :  { %1254 = vmatpush3.bf16.msra.mxu1 %v1432_v23  ;;  %1207 = vmatprep.mubr.msk.f32.mxu1 %vm1343_vm6, %v1344_v26 }
 0x852   :  { %1258 = vmatprep.subr.bf16.mxu1 %v1342_v22 }
 0x923   :  { %v495_v9 = vpop.f32.mrb[4].mxu1 }
 0x924   :  { %v499_v10 = vadd.f32 %v495_v9, %v164_v7  ;;  %v1202_v12 = vpop.f32.mrb[5].mxu1 }
 0x926   :  { %1290 = vtanh.f32 %v499_v10 }
 0x930   :  { %v1291_v13 = vpop.eup %1290 }
 0x931   :  { %v501_v14 = vmul.f32 0.5, %v1291_v13 }
 0x933   :  { %v502_v15 = vadd.f32 0.5, %v501_v14 }
 0x935   :  { %v503_v16 = vsel %vm1415_vm4, %v1291_v13, %v502_v15 }
 0x936   :  { %506 = vrot.lane.b32.xlu0 %v503_v16, %s1338_s1  ;;  %v504_v19 = vmul.f32 %v503_v16, %v417_v1 }
 0x9a8   :  { %v507_v17 = vpop.permute.xlu0 %506 }
 0x9a9   :  { %v509_v18 = vmul.f32 %v507_v17, %v503_v16 }
 0x9ab   :  { %511 = vrot.lane.b32.xlu1 %v509_v18, %s1339_s2 }
 0xa1d   :  { %v512_v20 = vpop.permute.xlu1 %511 }
 0xa1e   :  { %v514_v21 = vadd.f32 %v512_v20, %v504_v19 }
 0xa20   :  { %1292 = vtanh.f32 %v514_v21 }
 0xa2a   :  { %v1293_v27 = vpop.eup %1292 }
 0xa2b   :  { %517 = vrot.lane.b32.xlu0 %v1293_v27, %s1341_s14 }
 0xa9d   :  { %v518_v28 = vpop.permute.xlu0 %517 }
 0xa9e   :  { %v520_v29 = vmul.f32 %v518_v28, %v503_v16  ;;  %v184_v28 = vadd.f32 %v1181_v50, %v1408_v3  ;;  %v42_v3 = vld [vmem:[%s1587_s4] sm:$0xff] }
 0xaa0   :  { %522 = vrot.lane.b32.xlu1 %v520_v29, %s1345_s3 }
 0xb12   :  { %v523_v32 = vpop.permute.xlu1 %522 }
 0xb13   :  { %1208 = vmatmul.mubr.msk.f32.vlgmr.msra.gmra.mrb[6].mxu1 %vm227_vm7, %v523_v32 }
 0xb14   :  { %1260 = vmatpush3.bf16.msra.mxu1 %v1432_v23  ;;  %1221 = vmatprep.mubr.msk.f32.mxu1 %vm1343_vm6, %v1344_v26 }
 0xb15   :  { %1264 = vmatprep.subr.bf16.mxu1 %v1342_v22 }
 0xbe6   :  { %v592_v34 = vpop.f32.mrb[6].mxu1 }
 0xbe7   :  { %v596_v35 = vadd.f32 %v592_v34, %v169_v33  ;;  %v1209_v36 = vpop.f32.mrb[7].mxu1 }
 0xbe9   :  { %1294 = vtanh.f32 %v596_v35 }
 0xbf3   :  { %v1295_v37 = vpop.eup %1294 }
 0xbf4   :  { %v598_v38 = vmul.f32 0.5, %v1295_v37 }
 0xbf6   :  { %v599_v39 = vadd.f32 0.5, %v598_v38 }
 0xbf8   :  { %v600_v40 = vsel %vm1415_vm4, %v1295_v37, %v599_v39 }
 0xbf9   :  { %603 = vrot.lane.b32.xlu0 %v600_v40, %s1338_s1  ;;  %v601_v43 = vmul.f32 %v600_v40, %v514_v21 }
 0xc6b   :  { %v604_v41 = vpop.permute.xlu0 %603 }
 0xc6c   :  { %v606_v42 = vmul.f32 %v604_v41, %v600_v40 }
 0xc6e   :  { %608 = vrot.lane.b32.xlu1 %v606_v42, %s1339_s2 }
 0xce0   :  { %v609_v22 = vpop.permute.xlu1 %608 }
 0xce1   :  { %v611_v44 = vadd.f32 %v609_v22, %v601_v43 }
 0xce3   :  { %1296 = vtanh.f32 %v611_v44 }
 0xced   :  { %v1297_v47 = vpop.eup %1296 }
 0xcee   :  { %614 = vrot.lane.b32.xlu0 %v1297_v47, %s1341_s14 }
 0xd60   :  { %v615_v48 = vpop.permute.xlu0 %614 }
 0xd61   :  { %v617_v49 = vmul.f32 %v615_v48, %v600_v40  ;;  %v43_v40 = vld [vmem:[%s1587_s4 + $0x8] sm:$0xff]  ;;  %s1346_s4 = smov 8  }
 0xd62   :  { %v1265_v11 = vpack.c.bf16 %v43_v40, %v42_v3 }
 0xd63   :  { %619 = vrot.lane.b32.xlu1 %v617_v49, %s1345_s3 }
 0xdd5   :  { %v620_v52 = vpop.permute.xlu1 %619 }
 0xdd6   :  { %1215 = vmatmul.mubr.msk.f32.vlgmr.msra.gmra.mrb[8].mxu0 %vm227_vm7, %v620_v52 }
 0xdd7   :  { %1263 = vmatpush3.bf16.msra.mxu0 %v1432_v23  ;;  %1228 = vmatprep.mubr.msk.f32.mxu0 %vm1343_vm6, %v1344_v26 }
 0xdd8   :  { %1238 = vmatprep.subr.mxu0 %v1344_v26 }
 0xea9   :  { %v689_v54 = vpop.f32.mrb[8].mxu0 }
 0xeaa   :  { %v693_v55 = vadd.f32 %v689_v54, %v174_v53  ;;  %v1216_v56 = vpop.f32.mrb[9].mxu0 }
 0xeac   :  { %1298 = vtanh.f32 %v693_v55 }
 0xeb6   :  { %v1299_v57 = vpop.eup %1298 }
 0xeb7   :  { %v695_v58 = vmul.f32 0.5, %v1299_v57 }
 0xeb9   :  { %v696_v59 = vadd.f32 0.5, %v695_v58 }
 0xebb   :  { %v697_v60 = vsel %vm1415_vm4, %v1299_v57, %v696_v59 }
 0xebc   :  { %700 = vrot.lane.b32.xlu0 %v697_v60, %s1338_s1  ;;  %v698_v62 = vmul.f32 %v697_v60, %v611_v44  ;;  %v1129_v44 = vld [vmem:[%s1588_s5] ss:$0 sm:$0xff] }
 0xf2e   :  { %v701_v23 = vpop.permute.xlu0 %700 }
 0xf2f   :  { %v703_v61 = vmul.f32 %v701_v23, %v697_v60 }
 0xf31   :  { %705 = vrot.lane.b32.xlu1 %v703_v61, %s1339_s2  ;;  %v1131_v61 = vld [vmem:[%s1590_s7] ss:$0 sm:$0xff] }
 0xfa3   :  { %v706_v63 = vpop.permute.xlu1 %705 }
 0xfa4   :  { %v708_v0 = vadd.f32 %v706_v63, %v698_v62 }
 0xfa6   :  { %1300 = vtanh.f32 %v708_v0 }
 0xfb0   :  { %v1301_v1 = vpop.eup %1300 }
 0xfb1   :  { %711 = vrot.lane.b32.xlu0 %v1301_v1, %s1341_s14 }
0x1023   :  { %v712_v2 = vpop.permute.xlu0 %711 }
0x1024   :  { %v714_v4 = vmul.f32 %v712_v2, %v697_v60 }
0x1026   :  { %716 = vrot.lane.b32.xlu1 %v714_v4, %s1345_s3 }
0x1098   :  { %v717_v5 = vpop.permute.xlu1 %716 }
0x1099   :  { %1222 = vmatmul.mubr.msk.f32.vlgmr.msra.gmra.mrb[8].mxu1 %vm227_vm7, %v717_v5 }
0x109a   :  { %1235 = vmatprep.mubr.msk.f32.mxu1 %vm1343_vm6, %v1344_v26  ;;  %1266 = vmatpush3.bf16.msra.mxu1 %v1265_v11 }
0x116c   :  { %v786_v7 = vpop.f32.mrb[8].mxu1 }
0x116d   :  { %v790_v9 = vadd.f32 %v786_v7, %v179_v6  ;;  %v1223_v10 = vpop.f32.mrb[9].mxu1 }
0x116f   :  { %1302 = vtanh.f32 %v790_v9 }
0x1179   :  { %v1303_v12 = vpop.eup %1302 }
0x117a   :  { %v792_v13 = vmul.f32 0.5, %v1303_v12 }
0x117c   :  { %v793_v14 = vadd.f32 0.5, %v792_v13 }
0x117e   :  { %v794_v15 = vsel %vm1415_vm4, %v1303_v12, %v793_v14 }
0x117f   :  { %797 = vrot.lane.b32.xlu0 %v794_v15, %s1338_s1  ;;  %v795_v18 = vmul.f32 %v794_v15, %v708_v0 }
0x11f1   :  { %v798_v16 = vpop.permute.xlu0 %797 }
0x11f2   :  { %v800_v17 = vmul.f32 %v798_v16, %v794_v15 }
0x11f4   :  { %802 = vrot.lane.b32.xlu1 %v800_v17, %s1339_s2 }
0x1266   :  { %v803_v19 = vpop.permute.xlu1 %802 }
0x1267   :  { %v805_v20 = vadd.f32 %v803_v19, %v795_v18 }
0x1269   :  { %1304 = vtanh.f32 %v805_v20 }
0x1273   :  { %v1305_v21 = vpop.eup %1304 }
0x1274   :  { %808 = vrot.lane.b32.xlu0 %v1305_v21, %s1341_s14 }
0x12e6   :  { %v809_v24 = vpop.permute.xlu0 %808 }
0x12e7   :  { %v811_v25 = vmul.f32 %v809_v24, %v794_v15 }
0x12e9   :  { %813 = vrot.lane.b32.xlu1 %v811_v25, %s1345_s3 }
0x135b   :  { %v814_v27 = vpop.permute.xlu1 %813 }
0x135c   :  { %1229 = vmatmul.mubr.msk.f32.vlgmr.msra.gmra.mrb[10].mxu0 %vm227_vm7, %v814_v27 }
0x135d   :  { %1240 = vmatprep.mubr.msk.f32.mxu0 %vm1343_vm6, %v1344_v26  ;;  %1239 = vmatpush3.msra.mxu0 %v45_v8 }
0x142f   :  { %v883_v29 = vpop.f32.mrb[10].mxu0 }
0x1430   :  { %v887_v30 = vadd.f32 %v883_v29, %v184_v28  ;;  %v1230_v31 = vpop.f32.mrb[11].mxu0 }
0x1432   :  { %1306 = vtanh.f32 %v887_v30 }
0x143c   :  { %v1307_v32 = vpop.eup %1306 }
0x143d   :  { %v889_v33 = vmul.f32 0.5, %v1307_v32 }
0x143f   :  { %v890_v34 = vadd.f32 0.5, %v889_v33 }
0x1441   :  { %v891_v35 = vsel %vm1415_vm4, %v1307_v32, %v890_v34 }
0x1442   :  { %894 = vrot.lane.b32.xlu0 %v891_v35, %s1338_s1  ;;  %v892_v38 = vmul.f32 %v891_v35, %v805_v20 }
0x14b4   :  { %v895_v36 = vpop.permute.xlu0 %894 }
0x14b5   :  { %v897_v37 = vmul.f32 %v895_v36, %v891_v35 }
0x14b7   :  { %899 = vrot.lane.b32.xlu1 %v897_v37, %s1339_s2 }
0x1529   :  { %v900_v26 = vpop.permute.xlu1 %899 }
0x152a   :  { %v902_v39 = vadd.f32 %v900_v26, %v892_v38 }
0x152c   :  { %1308 = vtanh.f32 %v902_v39 }
0x1536   :  { %v1309_v41 = vpop.eup %1308 }
0x1537   :  { %905 = vrot.lane.b32.xlu0 %v1309_v41, %s1341_s14 }
0x15a9   :  { %v906_v42 = vpop.permute.xlu0 %905 }
0x15aa   :  { %v908_v43 = vmul.f32 %v906_v42, %v891_v35 }
0x15ac   :  { %916 = vrot.lane.b32.xlu1 %v908_v43, %s1345_s3 }
0x15b0   :  { %995 = vrot.lane.b32.xlu1 %v902_v39, %s1340_s13 }
0x161e   :  { %v917_v22 = vpop.permute.xlu1 %916 }
0x161f   :  { %1236 = vmatmul.mubr.msk.f32.vlgmr.msra.gmra.mrb[10].mxu1 %vm227_vm7, %v917_v22 }
0x1622   :  { %v996_v54 = vpop.permute.xlu1 %995 }
0x16f2   :  { %v986_v45 = vpop.f32.mrb[10].mxu1 }
0x16f3   :  { %v987_v46 = vadd.f32 %v1129_v44, %v986_v45  ;;  %v1237_v47 = vpop.f32.mrb[11].mxu1 }
0x16f5   :  { %1310 = vtanh.f32 %v987_v46 }
0x16ff   :  { %v1311_v48 = vpop.eup %1310 }
0x1700   :  { %v991_v49 = vmul.f32 0.5, %v1311_v48 }
0x1702   :  { %v992_v50 = vadd.f32 0.5, %v991_v49 }
0x1704   :  { %v993_v51 = vsel %vm194_vm10, %v1311_v48, %v992_v50 }
0x1705   :  { %1000 = vrot.lane.b32.xlu0 %v993_v51, %s1340_s13  ;;  %v998_v55 = vmul.f32 %v996_v54, %v993_v51  ;;  %s1347_s13 = smov 104  }
0x1777   :  { %v1001_v52 = vpop.permute.xlu0 %1000 }
0x1778   :  { %v1003_v53 = vmul.f32 %v1001_v52, %v993_v51 }
0x177a   :  { %1005 = vrot.lane.b32.xlu0 %v1003_v53, %s1346_s4 }
0x17ec   :  { %v1006_v56 = vpop.permute.xlu0 %1005 }
0x17ed   :  { %v1008_v57 = vadd.f32 %v1006_v56, %v998_v55 }
0x17ef   :  { %1312 = vtanh.f32 %v1008_v57 }
0x17f9   :  { %v1313_v58 = vpop.eup %1312 }
0x17fa   :  { %1011 = vrot.lane.b32.xlu1 %v1313_v58, %s1339_s2 }
0x186c   :  { %v1012_v59 = vpop.permute.xlu1 %1011 }
0x186d   :  { %v1014_v60 = vmul.f32 %v1012_v59, %v993_v51 }
0x186f   :  { %1022 = vrot.lane.b32.xlu0 %v1014_v60, %s1347_s13 }
0x18e1   :  { %v1023_v23 = vpop.permute.xlu0 %1022 }
0x18e2   :  { %1241 = vmatmul.mubr.msk.f32.vlgmr.msra.gmra.mrb[12].mxu0 %vm1024_vm11, %v1023_v23 }
0x19b5   :  { %v1093_v62 = vpop.f32.mrb[12].mxu0 }
0x19b6   :  { %v1094_v63 = vadd.f32 %v1131_v61, %v1093_v62  ;;  %v1242_v0 = vpop.f32.mrb[13].mxu0 }
0x19b8   :  { %1097 = vst [vmem:[#allocation2] sm:$0xff] %v1094_v63 }
0x19b9   :  { %1325 = shalt.err (!%p1322_p4)
}
0x19ba   :  { %s1326_s19 = scalar_lea.hbm %s1591_s8, 128 }
0x19bb   :  { %p1327_p5 = scmp.ne.s32.totalorder %s1591_s8, %s1326_s19  ;;  %p1330_p6 = scmp.lt.u32.totalorder %s1326_s19, %s1591_s8 }
0x19bd   :  { %p1332_p7 = pnand %p1330_p6, %p1327_p5 }
0x19bf   :  { %1335 = shalt.err (!%p1332_p7)
}
0x19c0   :  { %1107 = dma.vmem_to_hbm [thread:$0]  %s1105_s18, 128, %s1591_s8, [#allocation3]  }
0x19c1   :  { %1336 = dma.done.wait [#allocation3], 128  }
0x19c2   :  { %1337 = vsyncadd [#allocation3], 4294967168 }
0x19c3   :  { %1111 = vsyncpa [#allocation3], 1 }

</bundles_post_ra>
